<compile_context>
chip_gen: v7x
topology: tpu7x:2x2x1
jax: 0.10.0
libtpu: 0.0.40
codegen_flags: <defaults>
</compile_context>

<pallas_src>
import functools

import jax
import jax.numpy as jnp
from jax.experimental import pallas as pl
from jax.experimental.pallas import tpu as pltpu


def _round_up(n: int, m: int) -> int:
    return ((n + m - 1) // m) * m


def _mlp_log_softmax_kernel(x_ref, w1_ref, b1_ref, w2_ref, b2_ref,
                            w3_ref, b3_ref, o_ref, *, out_valid: int):
    # Cast the streamed f32 activations to bf16 on the VPU (which has slack);
    # this avoids a separate wrapper pass over x in HBM.
    x = x_ref[...].astype(jnp.bfloat16)

    # fc1 + ReLU  (bf16 operands, f32 MXU accumulate, f32 elementwise)
    h1 = jnp.dot(x, w1_ref[...], preferred_element_type=jnp.float32) + b1_ref[...]
    h1 = jnp.maximum(h1, 0.0).astype(jnp.bfloat16)     # bf16 intermediate

    # fc2 + ReLU
    h2 = jnp.dot(h1, w2_ref[...], preferred_element_type=jnp.float32) + b2_ref[...]
    h2 = jnp.maximum(h2, 0.0).astype(jnp.bfloat16)     # bf16 intermediate

    # fc3 (lane-dense 128-wide padded logits)
    logits = jnp.dot(h2, w3_ref[...], preferred_element_type=jnp.float32) + b3_ref[...]

    # Mask padded output columns so they vanish in the log-sum-exp.
    col = jax.lax.broadcasted_iota(jnp.int32, logits.shape, 1)
    logits = jnp.where(col < out_valid, logits, jnp.float32(-1e30))

    # Numerically-stable log_softmax over the last axis.
    m = jnp.max(logits, axis=-1, keepdims=True)
    shifted = logits - m
    lse = jnp.log(jnp.sum(jnp.exp(shifted), axis=-1, keepdims=True))
    o_ref[...] = shifted - lse


def prepare_params(params):
    """Pad/cast weights & biases ONCE (call outside the inference loop).

    Weights stored (in, out), bf16, output dims padded to multiples of 128
    (lane-dense). Biases f32. The fc1 input (contraction) dim is left at its
    natural size — the kernel reads it at full extent.
    """
    w1, b1, w2, b2, w3, b3 = params
    in_size, h1_size = w1.shape
    h2_size = w2.shape[1]
    out_size = w3.shape[1]

    h1_p = _round_up(h1_size, 128)
    h2_p = _round_up(h2_size, 128)
    out_p = _round_up(out_size, 128)

    bf16, f32 = jnp.bfloat16, jnp.float32
    w1p = jnp.zeros((in_size, h1_p), bf16).at[:, :h1_size].set(w1.astype(bf16))
    b1p = jnp.zeros((1, h1_p), f32).at[:, :h1_size].set(b1.astype(f32))
    w2p = jnp.zeros((h1_p, h2_p), bf16).at[:h1_size, :h2_size].set(w2.astype(bf16))
    b2p = jnp.zeros((1, h2_p), f32).at[:, :h2_size].set(b2.astype(f32))
    w3p = jnp.zeros((h2_p, out_p), bf16).at[:h2_size, :out_size].set(w3.astype(bf16))
    b3p = jnp.zeros((1, out_p), f32).at[:, :out_size].set(b3.astype(f32))

    meta = dict(in_size=in_size, h1_p=h1_p, h2_p=h2_p,
                out_p=out_p, out_size=out_size)
    return (w1p, b1p, w2p, b2p, w3p, b3p), meta


def simple_nn_forward(x, prepared, meta):
    """x: (B, C, H, W) float32 (NCHW, like PyTorch). Returns (B, output_size) f32."""
    w1p, b1p, w2p, b2p, w3p, b3p = prepared
    in_size = meta["in_size"]
    h1_p, h2_p, out_p = meta["h1_p"], meta["h2_p"], meta["out_p"]
    out_size = meta["out_size"]

    batch = x.shape[0]
    x2d = x.reshape(batch, -1).astype(jnp.float32)      # == x.view(x.shape[0], -1)
    assert x2d.shape[1] == in_size

    # Pad batch rows only to a multiple of 8 (sublane), never to a multiple
    # of the tile — ragged tails are handled by Pallas partial blocks.
    b8 = _round_up(batch, 8)
    if b8 != batch:
        x2d = jnp.zeros((b8, in_size), jnp.float32).at[:batch].set(x2d)

    # Batch tile: big enough to amortize ~0.35 us/step overhead, and chosen
    # as ~batch/2 so v7x's two TensorCores both get a grid step.
    cap = 2048
    tb = max(8, min(cap, _round_up(pl.cdiv(b8, 2), 8)))
    tb = min(tb, b8)
    grid = (pl.cdiv(b8, tb),)

    # Resident parameters: constant block index across all grid steps.
    def _const(i):
        return (0, 0)

    in_specs = [
        pl.BlockSpec((tb, in_size), lambda i: (i, 0)),   # x: streamed f32 batch tiles
        pl.BlockSpec((in_size, h1_p), _const),           # w1 (bf16)
        pl.BlockSpec((1, h1_p), _const),                 # b1 (f32)
        pl.BlockSpec((h1_p, h2_p), _const),              # w2 (bf16)
        pl.BlockSpec((1, h2_p), _const),                 # b2 (f32)
        pl.BlockSpec((h2_p, out_p), _const),             # w3 (bf16)
        pl.BlockSpec((1, out_p), _const),                # b3 (f32)
    ]
    out_spec = pl.BlockSpec((tb, out_p), lambda i: (i, 0))

    # VMEM budget: double-buffered x/out tiles + resident params + the
    # (tb, *) intermediates Mosaic keeps live (h1/h2 bf16, logits chain f32).
    bytes_x = 2 * tb * in_size * 4
    bytes_out = 2 * tb * out_p * 4
    bytes_w = 2 * ((in_size * h1_p + h1_p * h2_p + h2_p * out_p) * 2
                   + (h1_p + h2_p + out_p) * 4)
    bytes_mid = tb * (h1_p * 2 + h2_p * 2 + 3 * out_p * 4)
    vmem_bytes = bytes_x + bytes_out + bytes_w + bytes_mid
    vmem_limit = min(max(int(1.5 * vmem_bytes) + (2 << 20), 16 << 20), 60 << 20)

    kernel = functools.partial(_mlp_log_softmax_kernel, out_valid=out_size)

    out_padded = pl.pallas_call(
        kernel,
        out_shape=jax.ShapeDtypeStruct((b8, out_p), jnp.float32),
        grid_spec=pltpu.PrefetchScalarGridSpec(
            num_scalar_prefetch=0,
            grid=grid,
            in_specs=in_specs,
            out_specs=out_spec,
        ),
        compiler_params=pltpu.CompilerParams(
            dimension_semantics=("parallel",),
            vmem_limit_bytes=vmem_limit,
        ),
    )(x2d, w1p, b1p, w2p, b2p, w3p, b3p)

    return out_padded[:batch, :out_size]


def init_params(key, input_size, hidden_sizes, output_size):
    """PyTorch-style uniform(-1/sqrt(fan_in), 1/sqrt(fan_in)); weights stored (in, out)."""
    dims = [input_size, hidden_sizes[0], hidden_sizes[1], output_size]
    params = []
    for i in range(3):
        key, kw, kb = jax.random.split(key, 3)
        fan_in, fan_out = dims[i], dims[i + 1]
        bound = 1.0 / jnp.sqrt(jnp.float32(fan_in))
        w = jax.random.uniform(kw, (fan_in, fan_out), jnp.float32, -bound, bound)
        bvec = jax.random.uniform(kb, (1, fan_out), jnp.float32, -bound, bound)
        params += [w, bvec]
    return tuple(params)


def reference_forward(x, params, *, bf16_dots=False):
    """Plain-JAX reference. bf16_dots=True mirrors the kernel's MXU dtype."""
    w1, b1, w2, b2, w3, b3 = params
    x2d = x.reshape(x.shape[0], -1)

    def mm(a, w):
        if bf16_dots:
            return jnp.dot(a.astype(jnp.bfloat16), w.astype(jnp.bfloat16),
                           preferred_element_type=jnp.float32)
        return jnp.dot(a, w, preferred_element_type=jnp.float32)

    h1 = jnp.maximum(mm(x2d, w1) + b1, 0.0)
    h2 = jnp.maximum(mm(h1.astype(jnp.bfloat16) if bf16_dots else h1, w2) + b2, 0.0)
    logits = mm(h2.astype(jnp.bfloat16) if bf16_dots else h2, w3) + b3
    return jax.nn.log_softmax(logits, axis=1)


if __name__ == "__main__":
    key = jax.random.PRNGKey(0)
    kx, kp = jax.random.split(key)

    # Small shapes: batch=8, image 1x16x16 -> input_size=256,
    # hidden_sizes=[128, 64], output_size=10.
    batch, chan, spatial = 8, 1, 16
    input_size = chan * spatial * spatial
    hidden_sizes = [128, 64]
    output_size = 10

    x = jax.random.normal(kx, (batch, chan, spatial, spatial), jnp.float32)
    params = init_params(kp, input_size, hidden_sizes, output_size)

    # Pad/cast parameters once (outside the per-call forward).
    prepared, meta = prepare_params(params)

    out = simple_nn_forward(x, prepared, meta)
    out = jax.block_until_ready(out)
    assert out.shape == (batch, output_size)
    assert not jnp.any(jnp.isnan(out))

    # Tight check against a reference that mirrors the kernel's bf16 matmuls.
    ref_bf16 = reference_forward(x, params, bf16_dots=True)
    assert jnp.allclose(out, ref_bf16, atol=2e-3, rtol=2e-3)

    # Loose check against the full-f32 PyTorch-equivalent forward.
    ref_f32 = reference_forward(x, params, bf16_dots=False)
    assert jnp.allclose(out, ref_f32, atol=5e-2, rtol=5e-2)

    # log_softmax sanity: rows exponentiate to ~1.
    assert jnp.allclose(jnp.sum(jnp.exp(out), axis=1), 1.0, atol=1e-2)

    print("KERNEL_OK")
</pallas_src>

<mosaic_0001>
module attributes {stable_mosaic.version = 11 : i64} {
  func.func @_mlp_log_softmax_kernel(%arg0: i32, %arg1: memref<8x256xf32, #tpu.memory_space<vmem>>, %arg2: memref<256x128xbf16, #tpu.memory_space<vmem>>, %arg3: memref<1x128xf32, #tpu.memory_space<vmem>>, %arg4: memref<128x128xbf16, #tpu.memory_space<vmem>>, %arg5: memref<1x128xf32, #tpu.memory_space<vmem>>, %arg6: memref<128x128xbf16, #tpu.memory_space<vmem>>, %arg7: memref<1x128xf32, #tpu.memory_space<vmem>>, %arg8: memref<8x128xf32, #tpu.memory_space<vmem>>) attributes {dimension_semantics = [#tpu.dimension_semantics<parallel>], iteration_bounds = array<i64: 1>, scalar_prefetch = 0 : i64, scratch_operands = 0 : i64, tpu.core_type = #tpu.core_type<tc>, window_params = [{transform_indices = @transform_0, window_bounds = array<i64: 8, 256>}, {pipeline_mode = #tpu.pipeline_mode<synchronous>, transform_indices = @transform_1, window_bounds = array<i64: 256, 128>}, {pipeline_mode = #tpu.pipeline_mode<synchronous>, transform_indices = @transform_2, window_bounds = array<i64: 1, 128>}, {pipeline_mode = #tpu.pipeline_mode<synchronous>, transform_indices = @transform_3, window_bounds = array<i64: 128, 128>}, {pipeline_mode = #tpu.pipeline_mode<synchronous>, transform_indices = @transform_4, window_bounds = array<i64: 1, 128>}, {pipeline_mode = #tpu.pipeline_mode<synchronous>, transform_indices = @transform_5, window_bounds = array<i64: 128, 128>}, {pipeline_mode = #tpu.pipeline_mode<synchronous>, transform_indices = @transform_6, window_bounds = array<i64: 1, 128>}, {transform_indices = @transform_7, window_bounds = array<i64: 8, 128>}]} {
    %c0 = arith.constant 0 : index
    %c0_0 = arith.constant 0 : index
    %0 = vector.load %arg1[%c0, %c0_0] : memref<8x256xf32, #tpu.memory_space<vmem>>, vector<8x256xf32>
    %1 = arith.truncf %0 : vector<8x256xf32> to vector<8x256xbf16>
    %c0_1 = arith.constant 0 : index
    %c0_2 = arith.constant 0 : index
    %2 = vector.load %arg2[%c0_1, %c0_2] : memref<256x128xbf16, #tpu.memory_space<vmem>>, vector<256x128xbf16>
    %cst = arith.constant dense<0.000000e+00> : vector<8x128xf32>
    %3 = tpu.matmul %1, %2, %cst {dimension_numbers = #tpu.dot_dimension_numbers<[1], [0], [0], [1], [0, 0, 1, 1], [], []>} : vector<8x256xbf16>, vector<256x128xbf16>, vector<8x128xf32> -> vector<8x128xf32>
    %c0_3 = arith.constant 0 : index
    %c0_4 = arith.constant 0 : index
    %4 = vector.load %arg3[%c0_3, %c0_4] : memref<1x128xf32, #tpu.memory_space<vmem>>, vector<1x128xf32>
    %5 = vector.broadcast %4 : vector<1x128xf32> to vector<8x128xf32>
    %6 = arith.addf %3, %5 : vector<8x128xf32>
    %cst_5 = arith.constant 0.000000e+00 : f32
    %7 = vector.broadcast %cst_5 : f32 to vector<8x128xf32>
    %8 = arith.maximumf %6, %7 : vector<8x128xf32>
    %9 = arith.truncf %8 : vector<8x128xf32> to vector<8x128xbf16>
    %c0_6 = arith.constant 0 : index
    %c0_7 = arith.constant 0 : index
    %10 = vector.load %arg4[%c0_6, %c0_7] : memref<128x128xbf16, #tpu.memory_space<vmem>>, vector<128x128xbf16>
    %cst_8 = arith.constant dense<0.000000e+00> : vector<8x128xf32>
    %11 = tpu.matmul %9, %10, %cst_8 {dimension_numbers = #tpu.dot_dimension_numbers<[1], [0], [0], [1], [0, 0, 1, 1], [], []>} : vector<8x128xbf16>, vector<128x128xbf16>, vector<8x128xf32> -> vector<8x128xf32>
    %c0_9 = arith.constant 0 : index
    %c0_10 = arith.constant 0 : index
    %12 = vector.load %arg5[%c0_9, %c0_10] : memref<1x128xf32, #tpu.memory_space<vmem>>, vector<1x128xf32>
    %13 = vector.broadcast %12 : vector<1x128xf32> to vector<8x128xf32>
    %14 = arith.addf %11, %13 : vector<8x128xf32>
    %cst_11 = arith.constant 0.000000e+00 : f32
    %15 = vector.broadcast %cst_11 : f32 to vector<8x128xf32>
    %16 = arith.maximumf %14, %15 : vector<8x128xf32>
    %17 = arith.truncf %16 : vector<8x128xf32> to vector<8x128xbf16>
    %c0_12 = arith.constant 0 : index
    %c0_13 = arith.constant 0 : index
    %18 = vector.load %arg6[%c0_12, %c0_13] : memref<128x128xbf16, #tpu.memory_space<vmem>>, vector<128x128xbf16>
    %cst_14 = arith.constant dense<0.000000e+00> : vector<8x128xf32>
    %19 = tpu.matmul %17, %18, %cst_14 {dimension_numbers = #tpu.dot_dimension_numbers<[1], [0], [0], [1], [0, 0, 1, 1], [], []>} : vector<8x128xbf16>, vector<128x128xbf16>, vector<8x128xf32> -> vector<8x128xf32>
    %c0_15 = arith.constant 0 : index
    %c0_16 = arith.constant 0 : index
    %20 = vector.load %arg7[%c0_15, %c0_16] : memref<1x128xf32, #tpu.memory_space<vmem>>, vector<1x128xf32>
    %21 = vector.broadcast %20 : vector<1x128xf32> to vector<8x128xf32>
    %22 = arith.addf %19, %21 : vector<8x128xf32>
    %23 = tpu.iota {dimensions = array<i32: 1>} : vector<8x128xi32>
    %c10_i32 = arith.constant 10 : i32
    %24 = vector.broadcast %c10_i32 : i32 to vector<8x128xi32>
    %25 = arith.cmpi slt, %23, %24 : vector<8x128xi32>
    %cst_17 = arith.constant -1.000000e+30 : f32
    %26 = vector.broadcast %cst_17 : f32 to vector<8x128xf32>
    %27 = arith.select %25, %22, %26 : vector<8x128xi1>, vector<8x128xf32>
    %cst_18 = arith.constant dense<0xFF800000> : vector<8xf32>
    %28 = vector.multi_reduction <maximumf>, %27, %cst_18 [1] : vector<8x128xf32> to vector<8xf32>
    %29 = vector.shape_cast %28 : vector<8xf32> to vector<8x1xf32>
    %30 = vector.broadcast %29 : vector<8x1xf32> to vector<8x128xf32>
    %31 = arith.subf %27, %30 : vector<8x128xf32>
    %32 = math.exp %31 : vector<8x128xf32>
    %cst_19 = arith.constant dense<0.000000e+00> : vector<8xf32>
    %33 = vector.multi_reduction <add>, %32, %cst_19 [1] : vector<8x128xf32> to vector<8xf32>
    %34 = vector.shape_cast %33 : vector<8xf32> to vector<8x1xf32>
    %35 = math.log %34 : vector<8x1xf32>
    %36 = vector.broadcast %35 : vector<8x1xf32> to vector<8x128xf32>
    %37 = arith.subf %31, %36 : vector<8x128xf32>
    %c0_20 = arith.constant 0 : index
    %c0_21 = arith.constant 0 : index
    %38 = vector.load %arg8[%c0_20, %c0_21] : memref<8x128xf32, #tpu.memory_space<vmem>>, vector<8x128xf32>
    tpu.vector_store %arg8[%c0_20, %c0_21], %37 {strides = array<i32>} : memref<8x128xf32, #tpu.memory_space<vmem>>, vector<8x128xf32>,
    return
  }
  func.func @transform_0(%arg0: i32) -> (i32, i32) {
    %c0_i32 = arith.constant 0 : i32
    %c0_i32_0 = arith.constant 0 : i32
    return %arg0, %c0_i32 : i32, i32
  }
  func.func @transform_1(%arg0: i32) -> (i32, i32) {
    %c0_i32 = arith.constant 0 : i32
    %c0_i32_0 = arith.constant 0 : i32
    %c0_i32_1 = arith.constant 0 : i32
    return %c0_i32, %c0_i32_0 : i32, i32
  }
  func.func @transform_2(%arg0: i32) -> (i32, i32) {
    %c0_i32 = arith.constant 0 : i32
    %c0_i32_0 = arith.constant 0 : i32
    %c0_i32_1 = arith.constant 0 : i32
    return %c0_i32, %c0_i32_0 : i32, i32
  }
  func.func @transform_3(%arg0: i32) -> (i32, i32) {
    %c0_i32 = arith.constant 0 : i32
    %c0_i32_0 = arith.constant 0 : i32
    %c0_i32_1 = arith.constant 0 : i32
    return %c0_i32, %c0_i32_0 : i32, i32
  }
  func.func @transform_4(%arg0: i32) -> (i32, i32) {
    %c0_i32 = arith.constant 0 : i32
    %c0_i32_0 = arith.constant 0 : i32
    %c0_i32_1 = arith.constant 0 : i32
    return %c0_i32, %c0_i32_0 : i32, i32
  }
  func.func @transform_5(%arg0: i32) -> (i32, i32) {
    %c0_i32 = arith.constant 0 : i32
    %c0_i32_0 = arith.constant 0 : i32
    %c0_i32_1 = arith.constant 0 : i32
    return %c0_i32, %c0_i32_0 : i32, i32
  }
  func.func @transform_6(%arg0: i32) -> (i32, i32) {
    %c0_i32 = arith.constant 0 : i32
    %c0_i32_0 = arith.constant 0 : i32
    %c0_i32_1 = arith.constant 0 : i32
    return %c0_i32, %c0_i32_0 : i32, i32
  }
  func.func @transform_7(%arg0: i32) -> (i32, i32) {
    %c0_i32 = arith.constant 0 : i32
    %c0_i32_0 = arith.constant 0 : i32
    return %arg0, %c0_i32 : i32, i32
  }
}

</mosaic_0001>

<bundles_post_ra>
// kernel: tpu_custom_call.1
= control target key start
LH: loop header
LB: loop body
LE: loop exit
PB: predicated region body
PF: predicated region fallthrough
CT: control target
= control target key end

     0   :  { %12 = vsyncpa [#allocation3], 0  ;;  %s941_s0 = inlined_call_operand.hbm [shape: f32[8,256], index: 0, kind: input, shape index: {}]   ;;  %s942_s1 = inlined_call_operand.hbm [shape: bf16[256,128], index: 1, kind: input, shape index: {}]   ;;  %s943_s2 = inlined_call_operand.vmem [shape: f32[1,128], index: 2, kind: input, shape index: {}]   ;;  %s944_s3 = inlined_call_operand.hbm [shape: bf16[128,128], index: 3, kind: input, shape index: {}]   ;;  %s945_s4 = inlined_call_operand.vmem [shape: f32[1,128], index: 4, kind: input, shape index: {}]   ;;  %s946_s5 = inlined_call_operand.hbm [shape: bf16[128,128], index: 5, kind: input, shape index: {}]   ;;  %s947_s6 = inlined_call_operand.vmem [shape: f32[1,128], index: 6, kind: input, shape index: {}]   ;;  %s948_s7 = inlined_call_operand.hbm [shape: f32[8,128], index: 7, kind: output, shape index: {}]  }
   0x1   :  { %13 = vsyncpa [#allocation6], 0 }
   0x2   :  { %14 = vsyncpa [#allocation9], 0 }
   0x3   :  { %15 = vsyncpa [#allocation4], 0  ;;  %s796_s24 = smov [#allocation5]   ;;  %s678_s28 = scalar_lea.hbm %s942_s1, 2048 }
   0x4   :  { %s31_s25 = sshll.u32 %s796_s24, 4  ;;  %p679_p0 = scmp.ne.s32.totalorder %s942_s1, %s678_s28  ;;  %s32_s25 = int_to_ptr.vmem [resolvable:$true] %s31_s25 }
   0x5   :  { %p682_p1 = scmp.lt.u32.totalorder %s678_s28, %s942_s1 }
   0x7   :  { %p684_p2 = pnand %p682_p1, %p679_p0 }
   0x9   :  { %687 = shalt.err (!%p684_p2)
}
   0xa   :  { %s688_s10 = scalar_lea.vmem %s32_s25, 2048  ;;  %p693_p4 = scmp.lt.s32.totalorder %s32_s25, %s32_s25 }
   0xb   :  { %p689_p3 = scmp.ne.s32.totalorder %s32_s25, %s688_s10  ;;  %p694_p5 = scmp.lt.s32.totalorder %s688_s10, %s688_s10 }
   0xd   :  { %p695_p6 = por %p694_p5, %p693_p4 }
   0xf   :  { %p696_p7 = pnand %p695_p6, %p689_p3 }
  0x11   :  { %699 = shalt.err (!%p696_p7)
}
  0x12   :  { %s797_s11 = smov 64   ;;  %s798_s12 = smov 4  }
  0x13   :  { %37 = dma.hbm_to_vmem [thread:$0]  %s942_s1, 2048, %s32_s25, [#allocation6], %s797_s11, %s797_s11, %s798_s12  }
  0x14   :  { %s799_s15 = smov [#allocation2]   ;;  %s800_s17 = smov [#allocation7]  }
  0x15   :  { %s22_s16 = sshll.u32 %s799_s15, 4  ;;  %s45_s18 = sshll.u32 %s800_s17, 4  ;;  %s23_s16 = int_to_ptr.vmem [resolvable:$true] %s22_s16  ;;  %s46_s18 = int_to_ptr.vmem [resolvable:$true] %s45_s18 }
  0x16   :  { %s700_s21 = scalar_lea.hbm %s941_s0, 256 }
  0x17   :  { %p701_p8 = scmp.ne.s32.totalorder %s941_s0, %s700_s21  ;;  %p704_p9 = scmp.lt.u32.totalorder %s700_s21, %s941_s0 }
  0x19   :  { %p706_p10 = pnand %p704_p9, %p701_p8 }
  0x1b   :  { %709 = shalt.err (!%p706_p10)
}
  0x1c   :  { %s710_s1 = scalar_lea.vmem %s23_s16, 256  ;;  %p715_p12 = scmp.lt.s32.totalorder %s23_s16, %s23_s16 }
  0x1d   :  { %p711_p11 = scmp.ne.s32.totalorder %s23_s16, %s710_s1  ;;  %p716_p13 = scmp.lt.s32.totalorder %s710_s1, %s710_s1 }
  0x1f   :  { %p717_p0 = por %p716_p13, %p715_p12 }
  0x21   :  { %p718_p1 = pnand %p717_p0, %p711_p11 }
  0x23   :  { %721 = shalt.err (!%p718_p1)
}
  0x24   :  { %25 = dma.hbm_to_vmem [thread:$0]  %s941_s0, 256, %s23_s16, [#allocation3]  }
  0x25   :  { %s722_s30 = scalar_lea.hbm %s944_s3, 1024 }
  0x26   :  { %p723_p2 = scmp.ne.s32.totalorder %s944_s3, %s722_s30  ;;  %p726_p3 = scmp.lt.u32.totalorder %s722_s30, %s944_s3 }
  0x28   :  { %p728_p4 = pnand %p726_p3, %p723_p2 }
  0x2a   :  { %731 = shalt.err (!%p728_p4)
}
  0x2b   :  { %s732_s14 = scalar_lea.vmem %s46_s18, 1024  ;;  %p737_p6 = scmp.lt.s32.totalorder %s46_s18, %s46_s18 }
  0x2c   :  { %p733_p5 = scmp.ne.s32.totalorder %s46_s18, %s732_s14  ;;  %p738_p7 = scmp.lt.s32.totalorder %s732_s14, %s732_s14 }
  0x2e   :  { %p739_p8 = por %p738_p7, %p737_p6 }
  0x30   :  { %p740_p9 = pnand %p739_p8, %p733_p5 }
  0x32   :  { %743 = shalt.err (!%p740_p9)
}
  0x33   :  { %51 = dma.hbm_to_vmem [thread:$0]  %s944_s3, 1024, %s46_s18, [#allocation6], %s797_s11, %s797_s11, %s798_s12  }
  0x34   :  { %s801_s16 = smov [#allocation8]   ;;  %s744_s21 = scalar_lea.hbm %s946_s5, 1024 }
  0x35   :  { %s59_s17 = sshll.u32 %s801_s16, 4  ;;  %p745_p10 = scmp.ne.s32.totalorder %s946_s5, %s744_s21  ;;  %s60_s17 = int_to_ptr.vmem [resolvable:$true] %s59_s17 }
  0x36   :  { %p748_p11 = scmp.lt.u32.totalorder %s744_s21, %s946_s5 }
  0x38   :  { %p750_p12 = pnand %p748_p11, %p745_p10 }
  0x3a   :  { %753 = shalt.err (!%p750_p12)
}
  0x3b   :  { %s754_s1 = scalar_lea.vmem %s60_s17, 1024  ;;  %p759_p0 = scmp.lt.s32.totalorder %s60_s17, %s60_s17 }
  0x3c   :  { %p755_p13 = scmp.ne.s32.totalorder %s60_s17, %s754_s1  ;;  %p760_p1 = scmp.lt.s32.totalorder %s754_s1, %s754_s1 }
  0x3e   :  { %p761_p2 = por %p760_p1, %p759_p0 }
  0x40   :  { %p762_p3 = pnand %p761_p2, %p755_p13 }
  0x42   :  { %765 = shalt.err (!%p762_p3)
}
  0x43   :  { %65 = dma.hbm_to_vmem [thread:$0]  %s946_s5, 1024, %s60_s17, [#allocation9], %s797_s11, %s797_s11, %s798_s12  }
  0x44   :  { %788 = dma.done.wait [#allocation3], 256  }
  0x45   :  { %789 = vsyncadd [#allocation3], 4294967040 }
  0x46   :  { %790 = dma.done.wait [#allocation6], 3072  }
  0x47   :  { %791 = vsyncadd [#allocation6], 4294964224 }
  0x48   :  { %792 = dma.done.wait [#allocation9], 1024  }
  0x49   :  { %793 = vsyncadd [#allocation9], 4294966272  ;;  %v802_v0 = vmov 0.0   ;;  %v642_v1 = vld [vmem:[#allocation5 + $0x40] sm:$0xff]   ;;  %v644_v3 = vld [vmem:[#allocation5 + $0x48] sm:$0xff]   ;;  %vm803_vm0 = vmmov 0   ;;  %v486_v54 = vlaneseq }
  0x4a   :  { %593 = vmatprep.subr.bf16.mxu1 %v802_v0  ;;  %v643_v2 = vld [vmem:[#allocation5] sm:$0xff]   ;;  %553 = vmatprep.subr.bf16.mxu0 %v642_v1  ;;  %v645_v4 = vld [vmem:[#allocation5 + $0x8] sm:$0xff]   ;;  %v646_v5 = vld [vmem:[#allocation5 + $0x50] sm:$0xff]  }
  0x4b   :  { %554 = vmatpush3.bf16.msra.mxu0 %v643_v2  ;;  %v647_v6 = vld [vmem:[#allocation5 + $0x10] sm:$0xff]   ;;  %v648_v7 = vld [vmem:[#allocation5 + $0x58] sm:$0xff]   ;;  %v650_v9 = vld [vmem:[#allocation5 + $0x60] sm:$0xff]   ;;  %609 = vmatprep.mubr.msk.bf16.mxu1 %vm803_vm0, %v802_v0  ;;  %v487_v55 = vand.u32 127, %v486_v54 }
  0x4c   :  { %555 = vmatprep.subr.bf16.mxu0 %v644_v3  ;;  %v649_v8 = vld [vmem:[#allocation5 + $0x18] sm:$0xff]   ;;  %v651_v10 = vld [vmem:[#allocation5 + $0x20] sm:$0xff]   ;;  %v652_v11 = vld [vmem:[#allocation5 + $0x68] sm:$0xff]  }
  0x4d   :  { %v82_v12 = vld [vmem:[#allocation2 + $0x8] sm:$0xff]  ;;  %v658_v14 = vld [vmem:[#allocation7] sm:$0xff]   ;;  %v653_v15 = vld [vmem:[#allocation5 + $0x28] sm:$0xff]   ;;  %vm488_vm1 = vcmp.lt.s32.totalorder %v487_v55, 10 }
  0x4e   :  { %v84_v13 = vpack.c.bf16 %v82_v12, %v82_v12  ;;  %v654_v16 = vld [vmem:[#allocation5 + $0x70] sm:$0xff]   ;;  %594 = vmatpush3.bf16.msra.mxu1 %v658_v14  ;;  %v659_v17 = vld [vmem:[#allocation7 + $0x8] sm:$0xff]   ;;  %v656_v19 = vld [vmem:[#allocation5 + $0x78] sm:$0xff]  }
  0x4f   :  { %556 = vmatpush3.bf16.msra.mxu0 %v645_v4  ;;  %v655_v18 = vld [vmem:[#allocation5 + $0x30] sm:$0xff]   ;;  %595 = vmatprep.subr.bf16.mxu1 %v802_v0  ;;  %v657_v21 = vld [vmem:[#allocation5 + $0x38] sm:$0xff]   ;;  %v662_v25 = vld [vmem:[#allocation7 + $0x20] sm:$0xff]  }
  0x50   :  { %557 = vmatprep.subr.bf16.mxu0 %v646_v5  ;;  %252 = vmatprep.mubr.bf16.mxu0 %v84_v13  ;;  %v660_v20 = vld [vmem:[#allocation7 + $0x10] sm:$0xff]   ;;  %v661_v23 = vld [vmem:[#allocation7 + $0x18] sm:$0xff]   ;;  %v663_v26 = vld [vmem:[#allocation7 + $0x28] sm:$0xff]  }
  0x51   :  { %v81_v22 = vld [vmem:[#allocation2] sm:$0xff]  ;;  %v665_v28 = vld [vmem:[#allocation7 + $0x38] sm:$0xff]   ;;  %v666_v29 = vld [vmem:[#allocation8] sm:$0xff]  }
  0x52   :  { %596 = vmatpush3.bf16.msra.mxu1 %v659_v17  ;;  %v83_v24 = vpack.c.bf16 %v81_v22, %v81_v22  ;;  %v664_v27 = vld [vmem:[#allocation7 + $0x30] sm:$0xff]   ;;  %v667_v30 = vld [vmem:[#allocation8 + $0x8] sm:$0xff]   ;;  %v669_v32 = vld [vmem:[#allocation8 + $0x18] sm:$0xff]  }
  0x53   :  { %558 = vmatpush3.bf16.msra.mxu0 %v647_v6  ;;  %597 = vmatprep.subr.bf16.mxu1 %v802_v0  ;;  %v668_v31 = vld [vmem:[#allocation8 + $0x10] sm:$0xff]   ;;  %v670_v33 = vld [vmem:[#allocation8 + $0x20] sm:$0xff]   ;;  %v671_v34 = vld [vmem:[#allocation8 + $0x28] sm:$0xff]  }
  0x54   :  { %559 = vmatprep.subr.bf16.mxu0 %v648_v7  ;;  %v518_v36 = vld [vmem:[%s943_s2] ss:$0 sm:$0xff]  ;;  %v673_v45 = vld [vmem:[#allocation8 + $0x38] sm:$0xff]  }
  0x55   :  { %v672_v44 = vld [vmem:[#allocation8 + $0x30] sm:$0xff]  }
  0x56   :  { %598 = vmatpush3.bf16.msra.mxu1 %v660_v20  ;;  %v535_v46 = vld [vmem:[%s945_s4] ss:$0 sm:$0xff]  ;;  %s804_s4 = smov [#allocation10]  }
  0x57   :  { %560 = vmatpush3.bf16.msra.mxu0 %v649_v8  ;;  %599 = vmatprep.subr.bf16.mxu1 %v802_v0  ;;  %v544_v56 = vld [vmem:[%s947_s6] ss:$0 sm:$0xff]  ;;  %s507_s28 = sshll.u32 %s804_s4, 4  ;;  %s508_s28 = int_to_ptr.vmem [resolvable:$true] %s507_s28 }
  0x58   :  { %561 = vmatprep.subr.bf16.mxu0 %v650_v9  ;;  %s766_s6 = scalar_lea.vmem %s508_s28, 128  ;;  %p771_p5 = scmp.lt.s32.totalorder %s508_s28, %s508_s28 }
  0x59   :  { %p767_p4 = scmp.ne.s32.totalorder %s508_s28, %s766_s6  ;;  %p772_p6 = scmp.lt.s32.totalorder %s766_s6, %s766_s6 }
  0x5a   :  { %600 = vmatpush3.bf16.msra.mxu1 %v661_v23 }
  0x5b   :  { %562 = vmatpush3.bf16.msra.mxu0 %v651_v10  ;;  %601 = vmatprep.subr.bf16.mxu1 %v802_v0  ;;  %p773_p7 = por %p772_p6, %p771_p5 }
  0x5c   :  { %563 = vmatprep.subr.bf16.mxu0 %v652_v11 }
  0x5d   :  { %p774_p8 = pnand %p773_p7, %p767_p4 }
  0x5e   :  { %602 = vmatpush3.bf16.msra.mxu1 %v662_v25 }
  0x5f   :  { %564 = vmatpush3.bf16.msra.mxu0 %v653_v15  ;;  %603 = vmatprep.subr.bf16.mxu1 %v802_v0 }
  0x60   :  { %565 = vmatprep.subr.bf16.mxu0 %v654_v16 }
  0x62   :  { %604 = vmatpush3.bf16.msra.mxu1 %v663_v26 }
  0x63   :  { %566 = vmatpush3.bf16.msra.mxu0 %v655_v18  ;;  %605 = vmatprep.subr.bf16.mxu1 %v802_v0 }
  0x64   :  { %567 = vmatprep.subr.bf16.mxu0 %v656_v19 }
  0x66   :  { %606 = vmatpush3.bf16.msra.mxu1 %v664_v27 }
  0x67   :  { %568 = vmatpush3.bf16.msra.mxu0 %v657_v21  ;;  %607 = vmatprep.subr.bf16.mxu1 %v802_v0 }
  0x68   :  { %613 = vmatprep.subr.bf16.mxu0 %v802_v0 }
  0x6a   :  { %253 = vmatmul.mubr.bf16.vlgmr.msra.gmra.mrb[0].mxu0 %v83_v24  ;;  %608 = vmatpush3.bf16.msra.mxu1 %v665_v28 }
  0x6b   :  { %629 = vmatprep.mubr.msk.bf16.mxu0 %vm803_vm0, %v802_v0  ;;  %614 = vmatpush3.bf16.msra.mxu0 %v666_v29 }
  0x6c   :  { %615 = vmatprep.subr.bf16.mxu0 %v802_v0 }
  0x6f   :  { %616 = vmatpush3.bf16.msra.mxu0 %v667_v30 }
  0x70   :  { %617 = vmatprep.subr.bf16.mxu0 %v802_v0 }
  0x73   :  { %618 = vmatpush3.bf16.msra.mxu0 %v668_v31 }
  0x74   :  { %619 = vmatprep.subr.bf16.mxu0 %v802_v0 }
  0x77   :  { %620 = vmatpush3.bf16.msra.mxu0 %v669_v32 }
  0x78   :  { %621 = vmatprep.subr.bf16.mxu0 %v802_v0 }
  0x7b   :  { %622 = vmatpush3.bf16.msra.mxu0 %v670_v33 }
  0x7c   :  { %623 = vmatprep.subr.bf16.mxu0 %v802_v0 }
  0x7f   :  { %624 = vmatpush3.bf16.msra.mxu0 %v671_v34 }
  0x80   :  { %625 = vmatprep.subr.bf16.mxu0 %v802_v0 }
  0x83   :  { %626 = vmatpush3.bf16.msra.mxu0 %v672_v44 }
  0x84   :  { %627 = vmatprep.subr.bf16.mxu0 %v802_v0 }
  0x87   :  { %628 = vmatpush3.bf16.msra.mxu0 %v673_v45 }
 0x13d   :  { %v569_v35 = vpop.f32.mrb[0].mxu0 }
 0x13e   :  { %v570_v37 = vpop.f32.mrb[1].mxu0 }
 0x13f   :  { %v571_v38 = vadd.f32 %v570_v37, %v569_v35  ;;  %v572_v39 = vpop.f32.mrb[2].mxu0 }
 0x140   :  { %v573_v40 = vpop.f32.mrb[3].mxu0 }
 0x141   :  { %v255_v41 = vadd.f32 %v571_v38, %v518_v36 }
 0x143   :  { %v260_v42 = vmax.f32 %v255_v41, 0.0 }
 0x145   :  { %v261_v43 = vpack.c.bf16 %v260_v42, %v260_v42 }
 0x147   :  { %610 = vmatmul.mubr.bf16.vlgmr.msra.gmra.mrb[0].mxu1 %v261_v43 }
 0x21a   :  { %v367_v47 = vpop.f32.mrb[0].mxu1 }
 0x21b   :  { %v368_v48 = vadd.f32 %v535_v46, %v367_v47  ;;  %v611_v49 = vpop.f32.mrb[1].mxu1 }
 0x21c   :  { %v370_v50 = vpop.f32.mrb[2].mxu1 }
 0x21d   :  { %v373_v51 = vmax.f32 %v368_v48, 0.0  ;;  %v612_v52 = vpop.f32.mrb[3].mxu1 }
 0x21f   :  { %v374_v53 = vpack.c.bf16 %v373_v51, %v373_v51 }
 0x221   :  { %630 = vmatmul.mubr.bf16.vlgmr.msra.gmra.mrb[4].mxu0 %v374_v53 }
 0x2f4   :  { %v480_v57 = vpop.f32.mrb[4].mxu0 }
 0x2f5   :  { %v481_v58 = vadd.f32 %v544_v56, %v480_v57  ;;  %v631_v59 = vpop.f32.mrb[5].mxu0 }
 0x2f6   :  { %v483_v60 = vpop.f32.mrb[6].mxu0 }
 0x2f7   :  { %v632_v61 = vpop.f32.mrb[7].mxu0  ;;  %v489_v62 = vsel %vm488_vm1, %v481_v58, -1e+30 }
 0x2f8   :  { %490 = vmax.xlane.f32.xlu0 %v489_v62 }
 0x385   :  { %v491_v63 = vpop.xlane.xlu0 %490 }
 0x386   :  { %v492_v0 = vsub.f32 %v489_v62, %v491_v63 }
 0x388   :  { %v493_v1 = vmul.f32 1.442695, %v492_v0 }
 0x38a   :  { %674 = vpow2.f32 %v493_v1 }
 0x394   :  { %v675_v2 = vpop.eup %674 }
 0x395   :  { %495 = vadd.xlane.f32.xlu0 %v675_v2 }
 0x422   :  { %v496_v3 = vpop.xlane.xlu0 %495 }
 0x423   :  { %676 = vlog2.f32 %v496_v3 }
 0x42d   :  { %v677_v4 = vpop.eup %676 }
 0x42e   :  { %v498_v5 = vmul.f32 0.6931472, %v677_v4 }
 0x430   :  { %v499_v6 = vsub.f32 %v492_v0, %v498_v5 }
 0x432   :  { %500 = vst [vmem:[#allocation10] sm:$0xff] %v499_v6 }
 0x433   :  { %777 = shalt.err (!%p774_p8)
}
 0x434   :  { %s778_s8 = scalar_lea.hbm %s948_s7, 128 }
 0x435   :  { %p779_p9 = scmp.ne.s32.totalorder %s948_s7, %s778_s8  ;;  %p782_p10 = scmp.lt.u32.totalorder %s778_s8, %s948_s7 }
 0x437   :  { %p784_p11 = pnand %p782_p10, %p779_p9 }
 0x439   :  { %787 = shalt.err (!%p784_p11)
}
 0x43a   :  { %510 = dma.vmem_to_hbm [thread:$0]  %s508_s28, 128, %s948_s7, [#allocation4]  }
 0x43b   :  { %794 = dma.done.wait [#allocation4], 128  }
 0x43c   :  { %795 = vsyncadd [#allocation4], 4294967168 }
 0x43d   :  { %514 = vsyncpa [#allocation3], 1 }
 0x43e   :  { %515 = vsyncpa [#allocation6], 1 }
 0x43f   :  { %516 = vsyncpa [#allocation9], 1 }
 0x440   :  { %517 = vsyncpa [#allocation4], 1 }

</bundles_post_ra>
